<compile_context>
chip_gen: v7x
topology: tpu7x:2x2x1
jax: 0.10.0
libtpu: 0.0.40
codegen_flags: <defaults>
</compile_context>

<pallas_src>
import math

import jax
import jax.numpy as jnp
from jax.experimental import pallas as pl
from jax.experimental.pallas import tpu as pltpu


def _embed_kernel(x_ref, w_ref, o_ref):
    # x_ref: (bt, G*3), w_ref: (G*3, L), o_ref: (bt, L)  -- L % 128 == 0
    o_ref[...] = jnp.dot(
        x_ref[...], w_ref[...], preferred_element_type=jnp.float32
    ).astype(o_ref.dtype)


def embedding_forward(x, w, *, target_tile_bytes=2 * 1024 * 1024):
    """x: [B, M, 3] float32, w: [C, 3] float32 (PyTorch layout) -> [B, M, C]."""
    assert x.ndim == 3 and x.shape[-1] == 3
    B, M, K = x.shape
    C = w.shape[0]
    N = B * M

    # --- lane-dense slab geometry -------------------------------------------
    L = math.lcm(C, 128)     # slab row width in lanes (multiple of 128)
    G = L // C               # output rows packed per slab row
    Kb = K * G               # expanded (block-diagonal) contraction dim

    # y_slab = x_slab @ w_big, with w_big = kron(I_G, W^T): (Kb, L), tiny.
    w_big = jnp.kron(jnp.eye(G, dtype=w.dtype), w.T)

    # --- tile / grid sizing ---------------------------------------------------
    ns = -(-N // G)                                            # slab rows needed
    rows_target = max(8, (target_tile_bytes // (L * 4)) // 8 * 8)
    block_rows = min(rows_target, ((ns + 7) // 8) * 8)         # multiple of 8
    ns_pad = -(-ns // block_rows) * block_rows                 # whole tiles
    n_pad = ns_pad * G
    grid = (ns_pad // block_rows,)

    # --- reshape / pad inputs (wrapper-side, row-major identical) ------------
    x2d = x.reshape(N, K)
    if n_pad != N:
        x2d = jnp.pad(x2d, ((0, n_pad - N), (0, 0)))
    x_slab = x2d.reshape(ns_pad, Kb)

    y_slab = pl.pallas_call(
        _embed_kernel,
        out_shape=jax.ShapeDtypeStruct((ns_pad, L), x.dtype),
        grid=grid,
        in_specs=[
            pl.BlockSpec((block_rows, Kb), lambda i: (i, 0)),  # big row tile
            pl.BlockSpec((Kb, L), lambda i: (0, 0)),           # tiny weight
        ],
        out_specs=pl.BlockSpec((block_rows, L), lambda i: (i, 0)),
        compiler_params=pltpu.CompilerParams(
            dimension_semantics=("parallel",)
        ),
    )(x_slab, w_big)

    # slab rows flatten (row-major) to exactly y2d; drop padding rows.
    y2d = y_slab.reshape(-1)[: N * C].reshape(N, C)
    return y2d.reshape(B, M, C)


def init_weight(key, out_ch):
    """Xavier-uniform init of nn.Linear(3, out_ch, bias=False).weight -> [out_ch, 3]."""
    fan_in, fan_out = 3, out_ch
    bound = (6.0 / (fan_in + fan_out)) ** 0.5
    return jax.random.uniform(key, (out_ch, 3), jnp.float32, -bound, bound)


if __name__ == "__main__":
    key = jax.random.PRNGKey(0)
    k_x, k_w, k_x2 = jax.random.split(key, 3)

    # Small shapes consistent with the module forward: [B, M, 3] -> [B, M, C]
    B, M, out_ch = 2, 16, 32
    x = jax.random.normal(k_x, (B, M, 3), dtype=jnp.float32)
    w = init_weight(k_w, out_ch)                  # [C, 3], PyTorch layout

    y = embedding_forward(x, w)
    jax.block_until_ready(y)
    y_ref = jnp.einsum("bmk,ck->bmc", x, w)       # y = x @ W^T
    assert y.shape == (B, M, out_ch)
    assert jnp.allclose(y, y_ref, atol=1e-5, rtol=1e-5)

    # Second case exercises the wrapper's N-padding path (N not a multiple of
    # the pack factor G).
    x2 = jax.random.normal(k_x2, (2, 13, 3), dtype=jnp.float32)
    y2 = embedding_forward(x2, w)
    jax.block_until_ready(y2)
    y2_ref = jnp.einsum("bmk,ck->bmc", x2, w)
    assert y2.shape == (2, 13, out_ch)
    assert jnp.allclose(y2, y2_ref, atol=1e-5, rtol=1e-5)

    print("KERNEL_OK")
</pallas_src>

<mosaic_0001>
module attributes {stable_mosaic.version = 11 : i64} {
  func.func @_embed_kernel(%arg0: i32, %arg1: memref<8x12xf32, #tpu.memory_space<vmem>>, %arg2: memref<12x128xf32, #tpu.memory_space<vmem>>, %arg3: memref<8x128xf32, #tpu.memory_space<vmem>>) attributes {dimension_semantics = [#tpu.dimension_semantics<parallel>], iteration_bounds = array<i64: 1>, scalar_prefetch = 0 : i64, scratch_operands = 0 : i64, tpu.core_type = #tpu.core_type<tc>, window_params = [{transform_indices = @transform_0, window_bounds = array<i64: 8, 12>}, {pipeline_mode = #tpu.pipeline_mode<synchronous>, transform_indices = @transform_1, window_bounds = array<i64: 12, 128>}, {transform_indices = @transform_2, window_bounds = array<i64: 8, 128>}]} {
    %c0 = arith.constant 0 : index
    %c0_0 = arith.constant 0 : index
    %0 = vector.load %arg1[%c0, %c0_0] : memref<8x12xf32, #tpu.memory_space<vmem>>, vector<8x12xf32>
    %c0_1 = arith.constant 0 : index
    %c0_2 = arith.constant 0 : index
    %1 = vector.load %arg2[%c0_1, %c0_2] : memref<12x128xf32, #tpu.memory_space<vmem>>, vector<12x128xf32>
    %cst = arith.constant dense<0.000000e+00> : vector<8x128xf32>
    %2 = tpu.matmul %0, %1, %cst {dimension_numbers = #tpu.dot_dimension_numbers<[1], [0], [0], [1], [0, 0, 1, 1], [], []>} : vector<8x12xf32>, vector<12x128xf32>, vector<8x128xf32> -> vector<8x128xf32>
    %c0_3 = arith.constant 0 : index
    %c0_4 = arith.constant 0 : index
    %3 = vector.load %arg3[%c0_3, %c0_4] : memref<8x128xf32, #tpu.memory_space<vmem>>, vector<8x128xf32>
    tpu.vector_store %arg3[%c0_3, %c0_4], %2 {strides = array<i32>} : memref<8x128xf32, #tpu.memory_space<vmem>>, vector<8x128xf32>,
    return
  }
  func.func @transform_0(%arg0: i32) -> (i32, i32) {
    %c0_i32 = arith.constant 0 : i32
    %c0_i32_0 = arith.constant 0 : i32
    return %arg0, %c0_i32 : i32, i32
  }
  func.func @transform_1(%arg0: i32) -> (i32, i32) {
    %c0_i32 = arith.constant 0 : i32
    %c0_i32_0 = arith.constant 0 : i32
    %c0_i32_1 = arith.constant 0 : i32
    return %c0_i32, %c0_i32_0 : i32, i32
  }
  func.func @transform_2(%arg0: i32) -> (i32, i32) {
    %c0_i32 = arith.constant 0 : i32
    %c0_i32_0 = arith.constant 0 : i32
    return %arg0, %c0_i32 : i32, i32
  }
}

</mosaic_0001>

<bundles_post_ra>
// kernel: tpu_custom_call.1
= control target key start
LH: loop header
LB: loop body
LE: loop exit
PB: predicated region body
PF: predicated region fallthrough
CT: control target
= control target key end

     0   :  { %7 = vsyncpa [#allocation3], 0  ;;  %s300_s0 = inlined_call_operand.hbm [shape: f32[8,12], index: 0, kind: input, shape index: {}]   ;;  %s301_s1 = inlined_call_operand.hbm [shape: f32[12,128], index: 1, kind: input, shape index: {}]   ;;  %s302_s2 = inlined_call_operand.hbm [shape: f32[8,128], index: 2, kind: output, shape index: {}]  }
   0x1   :  { %8 = vsyncpa [#allocation6], 0 }
   0x2   :  { %9 = vsyncpa [#allocation4], 0  ;;  %s233_s9 = smov [#allocation2]   ;;  %s234_s11 = smov [#allocation5]  }
   0x3   :  { %s16_s10 = sshll.u32 %s233_s9, 4  ;;  %s25_s12 = sshll.u32 %s234_s11, 4  ;;  %s17_s10 = int_to_ptr.vmem [resolvable:$true] %s16_s10  ;;  %s257_s12 = int_to_ptr.vmem [resolvable:$true] %s25_s12 }
   0x4   :  { %s161_s15 = scalar_lea.hbm %s300_s0, 128 }
   0x5   :  { %p162_p0 = scmp.ne.s32.totalorder %s300_s0, %s161_s15  ;;  %p165_p1 = scmp.lt.u32.totalorder %s161_s15, %s300_s0 }
   0x7   :  { %p167_p2 = pnand %p165_p1, %p162_p0 }
   0x9   :  { %170 = shalt.err (!%p167_p2)
}
   0xa   :  { %s171_s20 = scalar_lea.vmem %s17_s10, 128  ;;  %p176_p4 = scmp.lt.s32.totalorder %s17_s10, %s17_s10 }
   0xb   :  { %p172_p3 = scmp.ne.s32.totalorder %s17_s10, %s171_s20  ;;  %p177_p5 = scmp.lt.s32.totalorder %s171_s20, %s171_s20 }
   0xd   :  { %p178_p6 = por %p177_p5, %p176_p4 }
   0xf   :  { %p179_p7 = pnand %p178_p6, %p172_p3 }
  0x11   :  { %182 = shalt.err (!%p179_p7)
}
  0x12   :  { %19 = dma.hbm_to_vmem [thread:$0]  %s300_s0, 128, %s17_s10, [#allocation3]  }
  0x13   :  { %s183_s25 = scalar_lea.hbm %s301_s1, 256 }
  0x14   :  { %p184_p8 = scmp.ne.s32.totalorder %s301_s1, %s183_s25  ;;  %p187_p9 = scmp.lt.u32.totalorder %s183_s25, %s301_s1 }
  0x16   :  { %p189_p10 = pnand %p187_p9, %p184_p8 }
  0x18   :  { %192 = shalt.err (!%p189_p10)
}
  0x19   :  { %s193_s30 = scalar_lea.vmem %s257_s12, 256  ;;  %p198_p12 = scmp.lt.s32.totalorder %s257_s12, %s257_s12 }
  0x1a   :  { %p194_p11 = scmp.ne.s32.totalorder %s257_s12, %s193_s30  ;;  %p199_p13 = scmp.lt.s32.totalorder %s193_s30, %s193_s30 }
  0x1c   :  { %p200_p0 = por %p199_p13, %p198_p12 }
  0x1e   :  { %p201_p1 = pnand %p200_p0, %p194_p11 }
  0x20   :  { %204 = shalt.err (!%p201_p1)
}
  0x21   :  { %s235_s0 = smov 128   ;;  %s236_s3 = smov 8  }
  0x22   :  { %31 = dma.hbm_to_vmem [thread:$0]  %s301_s1, 256, %s257_s12, [#allocation6], %s235_s0, %s235_s0, %s236_s3  }
  0x23   :  { %227 = dma.done.wait [#allocation3], 128  }
  0x24   :  { %228 = vsyncadd [#allocation3], 4294967168 }
  0x25   :  { %229 = dma.done.wait [#allocation6], 256  }
  0x26   :  { %230 = vsyncadd [#allocation6], 4294967040  ;;  %v237_v0 = vmov 0.0|0.0   ;;  %vm238_vm0 = vmmov 0   ;;  %v239_v1 = vmov 0.0   ;;  %vm45_vm1 = vcmask 1043456  }
  0x27   :  { %148 = vmatprep.subr.bf16.mxu0 %v237_v0  ;;  %145 = vmatprep.mubr.msk.f32.mxu0 %vm238_vm0, %v239_v1  ;;  %v39_v2 = vld [vmem:[#allocation5] sm:$0xff]  ;;  %v40_v3 = vld [vmem:[#allocation5 + $0x8] sm:$0xf]  ;;  %vm240_vm2 = vmmov 1   ;;  %v38_v5 = vld [vmem:[#allocation2] sm:$0xff]  ;;  %vm41_vm4 = vcmask 97280  }
  0x28   :  { %vm150_vm3 = vmpackc.low %vm45_vm1, %vm240_vm2  ;;  %v149_v4 = vpack.c.bf16 %v40_v3, %v39_v2  ;;  %s241_s1 = smov [#allocation7]  }
  0x29   :  { %s126_s6 = sshll.u32 %s241_s1, 4  ;;  %s127_s6 = int_to_ptr.vmem [resolvable:$true] %s126_s6 }
  0x2a   :  { %151 = vmatpush3.bf16.msk.msra.mxu0 %vm150_vm3, %v149_v4  ;;  %s205_s7 = scalar_lea.vmem %s127_s6, 128  ;;  %p210_p3 = scmp.lt.s32.totalorder %s127_s6, %s127_s6 }
  0x2b   :  { %p206_p2 = scmp.ne.s32.totalorder %s127_s6, %s205_s7  ;;  %p211_p4 = scmp.lt.s32.totalorder %s205_s7, %s205_s7 }
  0x2d   :  { %146 = vmatmul.mubr.msk.f32.vlgmr.msra.gmra.mrb[0].mxu0 %vm41_vm4, %v38_v5  ;;  %p212_p5 = por %p211_p4, %p210_p3 }
  0x2f   :  { %p213_p6 = pnand %p212_p5, %p206_p2 }
 0x100   :  { %v115_v6 = vpop.f32.mrb[0].mxu0 }
 0x101   :  { %119 = vst [vmem:[#allocation7] sm:$0xff] %v115_v6  ;;  %v147_v7 = vpop.f32.mrb[1].mxu0 }
 0x102   :  { %216 = shalt.err (!%p213_p6)
}
 0x103   :  { %s217_s10 = scalar_lea.hbm %s302_s2, 128 }
 0x104   :  { %p218_p7 = scmp.ne.s32.totalorder %s302_s2, %s217_s10  ;;  %p221_p8 = scmp.lt.u32.totalorder %s217_s10, %s302_s2 }
 0x106   :  { %p223_p9 = pnand %p221_p8, %p218_p7 }
 0x108   :  { %226 = shalt.err (!%p223_p9)
}
 0x109   :  { %129 = dma.vmem_to_hbm [thread:$0]  %s127_s6, 128, %s302_s2, [#allocation4]  }
 0x10a   :  { %231 = dma.done.wait [#allocation4], 128  }
 0x10b   :  { %232 = vsyncadd [#allocation4], 4294967168 }
 0x10c   :  { %133 = vsyncpa [#allocation3], 1 }
 0x10d   :  { %134 = vsyncpa [#allocation6], 1 }
 0x10e   :  { %135 = vsyncpa [#allocation4], 1 }

</bundles_post_ra>
